<compile_context>
chip_gen: v5e
topology: v5e:2x2
jax: 0.10.0
libtpu: 0.0.40
codegen_flags: <defaults>
</compile_context>

<pallas_src>
import math

import numpy as np
import jax
import jax.numpy as jnp
from jax.experimental import pallas as pl
from jax.experimental.pallas import tpu as pltpu


def shconv_kernel(x_ref, w_ref, e_ref, o_ref):
    """Per-grid-point tiles:
         x_ref: (Cin, tK)        input spectrum of one batch element / K tile
         w_ref: (Cin, tCo, L+1)  compact per-degree filter (Cout tile)
         e_ref: (L+1, tK)        one-hot degree-expansion matrix for this K tile
         o_ref: (tCo, tK)        output tile
    """
    cin = w_ref.shape[0]
    e = e_ref[...].astype(jnp.float32)  # hoisted out of the Cin loop

    def body(ci, acc):
        # MXU: expand channel ci's per-degree coefficients to per-harmonic coefficients.
        w_ci = jnp.dot(w_ref[ci].astype(jnp.float32), e,
                       preferred_element_type=jnp.float32)        # (tCo, tK)
        # VPU: multiply by the input spectrum of channel ci and accumulate.
        x_ci = x_ref[pl.ds(ci, 1), :].astype(jnp.float32)          # (1, tK)
        return acc + x_ci * w_ci

    acc = jax.lax.fori_loop(0, cin, body,
                            jnp.zeros(o_ref.shape, jnp.float32), unroll=True)
    o_ref[...] = acc.astype(o_ref.dtype)


def shconv_pallas(x, w_l, *, tco=None, tk=None):
    """x: [B, Cin, (L+1)**2], w_l: [Cin, Cout, L+1] -> [B, Cout, (L+1)**2]."""
    B, Cin, K = x.shape
    cin_w, Cout, Lp1 = w_l.shape
    assert cin_w == Cin and K == Lp1 * Lp1

    # Lane-dense spectral axis: pad K up to a multiple of 128 (e.g. 81 -> 128).
    K_pad = (K + 127) // 128 * 128
    if tk is None:
        tk = next(t for t in (512, 384, 256, 128) if K_pad % t == 0)
    if tco is None:
        tco = math.gcd(Cout, 128) if Cout % 8 == 0 else Cout
    assert K_pad % tk == 0 and Cout % tco == 0

    x_p = x if K_pad == K else jnp.pad(x, ((0, 0), (0, 0), (0, K_pad - K)))

    # One-hot degree-expansion matrix: E[l, k] = 1 iff coefficient k has degree l.
    # (Padded k columns are all-zero.)
    deg = np.repeat(np.arange(Lp1), 2 * np.arange(Lp1) + 1)       # length K
    e_np = np.zeros((Lp1, K_pad), dtype=np.float32)
    e_np[deg, np.arange(K)] = 1.0
    e = jnp.asarray(e_np)

    grid = (B, Cout // tco, K_pad // tk)

    out = pl.pallas_call(
        shconv_kernel,
        out_shape=jax.ShapeDtypeStruct((B, Cout, K_pad), x.dtype),
        grid=grid,
        in_specs=[
            # per-batch, per-K-tile slice of x
            pl.BlockSpec((pl.Squeezed(), Cin, tk), lambda b, j, t: (b, 0, t)),
            # compact filter: only depends on the Cout-tile index
            pl.BlockSpec((Cin, tco, Lp1), lambda b, j, t: (0, j, 0)),
            # degree-expansion one-hot: only depends on the K-tile index
            pl.BlockSpec((Lp1, tk), lambda b, j, t: (0, t)),
        ],
        out_specs=pl.BlockSpec((pl.Squeezed(), tco, tk), lambda b, j, t: (b, j, t)),
        compiler_params=pltpu.CompilerParams(
            dimension_semantics=("parallel", "parallel", "parallel"),
            vmem_limit_bytes=32 * 1024 * 1024,
        ),
    )(x_p, w_l, e)

    return out if K_pad == K else out[:, :, :K]


def build_compact_filter(weight, L, interval):
    """Linear interpolation of anchor coefficients -> per-degree filter [Cin, Cout, L+1]."""
    Cin, Cout, ncpt, _ = weight.shape
    interval2 = 1 if interval == 1 else L - (ncpt - 2) * interval
    l0 = jnp.tile(jnp.arange(interval, dtype=weight.dtype) / interval,
                  ncpt - 2).reshape(ncpt - 2, interval)
    l1 = (jnp.arange(interval2 + 1, dtype=weight.dtype) / interval2).reshape(1, interval2 + 1)
    w1 = ((1.0 - l0) * weight[:, :, :-2, :] + l0 * weight[:, :, 1:-1, :]).reshape(Cin, Cout, -1)
    w2 = ((1.0 - l1) * weight[:, :, -2:-1, :] + l1 * weight[:, :, -1:, :]).reshape(Cin, Cout, -1)
    return jnp.concatenate([w1, w2], axis=2)                       # [Cin, Cout, L+1]


def reference_forward(x, weight, L, interval):
    """Pure-JAX replica of the PyTorch SHConv.forward (degree-expanded filter)."""
    w_l = build_compact_filter(weight, L, interval)
    repeats = jnp.array([2 * l + 1 for l in range(L + 1)])
    w = jnp.repeat(w_l, repeats, axis=2, total_repeat_length=(L + 1) ** 2)  # [Cin,Cout,K]
    return jnp.sum(w[None, :, :, :] * x[:, :, None, :], axis=1)             # [B,Cout,K]


if __name__ == "__main__":
    # Small, module-consistent shapes.
    B, Cin, Cout, L, interval = 2, 4, 6, 8, 2
    K = (L + 1) ** 2                      # 81
    ncpt = math.ceil(L / interval) + 1    # 5

    # Deterministic parameter init (matches SHConv.__init__ uniform(-stdv, stdv)).
    stdv = 1.0 / math.sqrt(Cin * (L + 1))
    key = jax.random.PRNGKey(0)
    kw, kx = jax.random.split(key)
    weight = jax.random.uniform(kw, (Cin, Cout, ncpt, 1),
                                dtype=jnp.float32, minval=-stdv, maxval=stdv)
    x = jax.random.normal(kx, (B, Cin, K), dtype=jnp.float32)

    w_l = build_compact_filter(weight, L, interval)               # [Cin, Cout, L+1]
    out = jax.block_until_ready(shconv_pallas(x, w_l))

    ref = reference_forward(x, weight, L, interval)
    assert out.shape == (B, Cout, K)
    assert jnp.allclose(out, ref, atol=1e-5, rtol=1e-5)
    print("KERNEL_OK")
</pallas_src>

<mosaic_0001>
module attributes {stable_mosaic.version = 11 : i64} {
  func.func @shconv_kernel(%arg0: i32, %arg1: i32, %arg2: i32, %arg3: memref<1x4x128xf32, #tpu.memory_space<vmem>>, %arg4: memref<4x6x9xf32, #tpu.memory_space<vmem>>, %arg5: memref<9x128xf32, #tpu.memory_space<vmem>>, %arg6: memref<1x6x128xf32, #tpu.memory_space<vmem>>) attributes {dimension_semantics = [#tpu.dimension_semantics<parallel>, #tpu.dimension_semantics<parallel>, #tpu.dimension_semantics<parallel>], iteration_bounds = array<i64: 2, 1, 1>, scalar_prefetch = 0 : i64, scratch_operands = 0 : i64, tpu.core_type = #tpu.core_type<tc>, window_params = [{transform_indices = @transform_0, window_bounds = array<i64: 1, 4, 128>}, {transform_indices = @transform_1, window_bounds = array<i64: 4, 6, 9>}, {transform_indices = @transform_2, window_bounds = array<i64: 9, 128>}, {transform_indices = @transform_3, window_bounds = array<i64: 1, 6, 128>}]} {
    %c0 = arith.constant 0 : index
    %c0_0 = arith.constant 0 : index
    %0 = vector.load %arg5[%c0, %c0_0] : memref<9x128xf32, #tpu.memory_space<vmem>>, vector<9x128xf32>
    %cst = arith.constant 0.000000e+00 : f32
    %1 = vector.broadcast %cst : f32 to vector<6x128xf32>
    %c0_i32 = arith.constant 0 : i32
    %2 = arith.index_cast %c0_i32 : i32 to index
    %c0_1 = arith.constant 0 : index
    %c0_2 = arith.constant 0 : index
    %3 = vector.load %arg4[%2, %c0_1, %c0_2] : memref<4x6x9xf32, #tpu.memory_space<vmem>>, vector<1x6x9xf32>
    %4 = vector.shape_cast %3 : vector<1x6x9xf32> to vector<6x9xf32>
    %cst_3 = arith.constant dense<0.000000e+00> : vector<6x128xf32>
    %5 = tpu.matmul %4, %0, %cst_3 {dimension_numbers = #tpu.dot_dimension_numbers<[1], [0], [0], [1], [0, 0, 1, 1], [], []>} : vector<6x9xf32>, vector<9x128xf32>, vector<6x128xf32> -> vector<6x128xf32>
    %c0_4 = arith.constant 0 : index
    %6 = arith.index_cast %c0_i32 : i32 to index
    %c0_5 = arith.constant 0 : index
    %7 = vector.load %arg3[%c0_4, %6, %c0_5] : memref<1x4x128xf32, #tpu.memory_space<vmem>>, vector<1x1x128xf32>
    %8 = vector.shape_cast %7 : vector<1x1x128xf32> to vector<1x128xf32>
    %9 = vector.broadcast %8 : vector<1x128xf32> to vector<6x128xf32>
    %10 = arith.mulf %9, %5 : vector<6x128xf32>
    %11 = arith.addf %1, %10 : vector<6x128xf32>
    %c1_i32 = arith.constant 1 : i32
    %12 = arith.index_cast %c1_i32 : i32 to index
    %c0_6 = arith.constant 0 : index
    %c0_7 = arith.constant 0 : index
    %13 = vector.load %arg4[%12, %c0_6, %c0_7] : memref<4x6x9xf32, #tpu.memory_space<vmem>>, vector<1x6x9xf32>
    %14 = vector.shape_cast %13 : vector<1x6x9xf32> to vector<6x9xf32>
    %cst_8 = arith.constant dense<0.000000e+00> : vector<6x128xf32>
    %15 = tpu.matmul %14, %0, %cst_8 {dimension_numbers = #tpu.dot_dimension_numbers<[1], [0], [0], [1], [0, 0, 1, 1], [], []>} : vector<6x9xf32>, vector<9x128xf32>, vector<6x128xf32> -> vector<6x128xf32>
    %c0_9 = arith.constant 0 : index
    %16 = arith.index_cast %c1_i32 : i32 to index
    %c0_10 = arith.constant 0 : index
    %17 = vector.load %arg3[%c0_9, %16, %c0_10] : memref<1x4x128xf32, #tpu.memory_space<vmem>>, vector<1x1x128xf32>
    %18 = vector.shape_cast %17 : vector<1x1x128xf32> to vector<1x128xf32>
    %19 = vector.broadcast %18 : vector<1x128xf32> to vector<6x128xf32>
    %20 = arith.mulf %19, %15 : vector<6x128xf32>
    %21 = arith.addf %11, %20 : vector<6x128xf32>
    %c2_i32 = arith.constant 2 : i32
    %22 = arith.index_cast %c2_i32 : i32 to index
    %c0_11 = arith.constant 0 : index
    %c0_12 = arith.constant 0 : index
    %23 = vector.load %arg4[%22, %c0_11, %c0_12] : memref<4x6x9xf32, #tpu.memory_space<vmem>>, vector<1x6x9xf32>
    %24 = vector.shape_cast %23 : vector<1x6x9xf32> to vector<6x9xf32>
    %cst_13 = arith.constant dense<0.000000e+00> : vector<6x128xf32>
    %25 = tpu.matmul %24, %0, %cst_13 {dimension_numbers = #tpu.dot_dimension_numbers<[1], [0], [0], [1], [0, 0, 1, 1], [], []>} : vector<6x9xf32>, vector<9x128xf32>, vector<6x128xf32> -> vector<6x128xf32>
    %c0_14 = arith.constant 0 : index
    %26 = arith.index_cast %c2_i32 : i32 to index
    %c0_15 = arith.constant 0 : index
    %27 = vector.load %arg3[%c0_14, %26, %c0_15] : memref<1x4x128xf32, #tpu.memory_space<vmem>>, vector<1x1x128xf32>
    %28 = vector.shape_cast %27 : vector<1x1x128xf32> to vector<1x128xf32>
    %29 = vector.broadcast %28 : vector<1x128xf32> to vector<6x128xf32>
    %30 = arith.mulf %29, %25 : vector<6x128xf32>
    %31 = arith.addf %21, %30 : vector<6x128xf32>
    %c3_i32 = arith.constant 3 : i32
    %32 = arith.index_cast %c3_i32 : i32 to index
    %c0_16 = arith.constant 0 : index
    %c0_17 = arith.constant 0 : index
    %33 = vector.load %arg4[%32, %c0_16, %c0_17] : memref<4x6x9xf32, #tpu.memory_space<vmem>>, vector<1x6x9xf32>
    %34 = vector.shape_cast %33 : vector<1x6x9xf32> to vector<6x9xf32>
    %cst_18 = arith.constant dense<0.000000e+00> : vector<6x128xf32>
    %35 = tpu.matmul %34, %0, %cst_18 {dimension_numbers = #tpu.dot_dimension_numbers<[1], [0], [0], [1], [0, 0, 1, 1], [], []>} : vector<6x9xf32>, vector<9x128xf32>, vector<6x128xf32> -> vector<6x128xf32>
    %c0_19 = arith.constant 0 : index
    %36 = arith.index_cast %c3_i32 : i32 to index
    %c0_20 = arith.constant 0 : index
    %37 = vector.load %arg3[%c0_19, %36, %c0_20] : memref<1x4x128xf32, #tpu.memory_space<vmem>>, vector<1x1x128xf32>
    %38 = vector.shape_cast %37 : vector<1x1x128xf32> to vector<1x128xf32>
    %39 = vector.broadcast %38 : vector<1x128xf32> to vector<6x128xf32>
    %40 = arith.mulf %39, %35 : vector<6x128xf32>
    %41 = arith.addf %31, %40 : vector<6x128xf32>
    %c4_i32 = arith.constant 4 : i32
    %c0_21 = arith.constant 0 : index
    %c0_22 = arith.constant 0 : index
    %c0_23 = arith.constant 0 : index
    %42 = vector.load %arg6[%c0_21, %c0_22, %c0_23] : memref<1x6x128xf32, #tpu.memory_space<vmem>>, vector<1x6x128xf32>
    %43 = vector.shape_cast %42 : vector<1x6x128xf32> to vector<6x128xf32>
    %44 = vector.shape_cast %41 : vector<6x128xf32> to vector<1x6x128xf32>
    tpu.vector_store %arg6[%c0_21, %c0_22, %c0_23], %44 {strides = array<i32>} : memref<1x6x128xf32, #tpu.memory_space<vmem>>, vector<1x6x128xf32>,
    return
  }
  func.func @transform_0(%arg0: i32, %arg1: i32, %arg2: i32) -> (i32, i32, i32) {
    %c0_i32 = arith.constant 0 : i32
    %c0_i32_0 = arith.constant 0 : i32
    return %arg0, %c0_i32, %arg2 : i32, i32, i32
  }
  func.func @transform_1(%arg0: i32, %arg1: i32, %arg2: i32) -> (i32, i32, i32) {
    %c0_i32 = arith.constant 0 : i32
    %c0_i32_0 = arith.constant 0 : i32
    %c0_i32_1 = arith.constant 0 : i32
    return %c0_i32, %arg1, %c0_i32_0 : i32, i32, i32
  }
  func.func @transform_2(%arg0: i32, %arg1: i32, %arg2: i32) -> (i32, i32) {
    %c0_i32 = arith.constant 0 : i32
    %c0_i32_0 = arith.constant 0 : i32
    return %c0_i32, %arg2 : i32, i32
  }
  func.func @transform_3(%arg0: i32, %arg1: i32, %arg2: i32) -> (i32, i32, i32) {
    %c0_i32 = arith.constant 0 : i32
    return %arg0, %arg1, %arg2 : i32, i32, i32
  }
}

</mosaic_0001>

<bundles_post_ra>
// kernel: tpu_custom_call.1
= control target key start
LH: loop header
LB: loop body
LE: loop exit
PB: predicated region body
PF: predicated region fallthrough
CT: control target
= control target key end

     0   :  { %s581_s12 = smov 0   ;;  %s583_s13 = smov 0   ;;  %s640_s0 = inlined_call_operand.vmem [shape: f32[2,4,128], index: 0, kind: input, shape index: {}]   ;;  %s641_s1 = inlined_call_operand.vmem [shape: f32[4,6,9], index: 1, kind: input, shape index: {}]   ;;  %s642_s2 = inlined_call_operand.vmem [shape: f32[9,128], index: 2, kind: input, shape index: {}]   ;;  %s643_s3 = inlined_call_operand.vmem [shape: f32[2,6,128], index: 3, kind: output, shape index: {}]  }
   0x1   :  { %s585_s14 = smov 0  }
   0x2 LB: > { %s32_s15 = sadd.s32 1, %s555_s13  ;;  %p493_p0 = scmp.ge.s32.totalorder %s559_s14, 1  ;;  %s559_s14 = sphi %s585_s14, %s13_s14   ;;  %s555_s13 = sphi %s583_s13, %s645_s13   ;;  %s551_s12 = sphi %s581_s12, %s644_s12  }
   0x3   : > { %p34_p1 = scmp.ge.s32.totalorder %s32_s15, 2  ;;  %p182_p2 = scmp.lt.s32.totalorder %s559_s14, 3 }
   0x5   : > { %s647_s15 = smov (%p34_p1, %s32_s15), 0  ;;  %p183_p3 = pnand %p493_p0, %p182_p2 }
   0x6   : > { %p221_p4 = scmp.lt.s32.totalorder (!%p183_p3), %s551_s12, 1 }
   0x7   : > { %186 = sbr.rel (%p183_p3) target bundleno = 155 (0x9b), region = 32 }
   0xc   : > { %v247_v0 = vld [vmem:[%s642_s2 + $0x8] sm:$0x1]  ;;  %vm253_vm0 = vcmask 1040384   ;;  %v246_v1 = vld [vmem:[%s642_s2] sm:$0xff]  ;;  %vm249_vm1 = vcmask 72704   ;;  %s649_s12 = smov (!%p221_p4, %s551_s12), 1 }
   0xd   : > { %502 = vmatpush.msk.msra.mxu2 %vm253_vm0, %v247_v0  ;;  %505 = vmatpush.msk.msra.mxu3 %vm253_vm0, %v247_v0  ;;  %v501_v2 = vld [vmem:[%s641_s1 + $0x10] sm:$0x3f]  ;;  %v504_v3 = vld [vmem:[%s641_s1 + $0x18] sm:$0x3f]  ;;  %v248_v4 = vld [vmem:[%s641_s1] sm:$0x3f] }
   0xe   : > { %496 = vmatpush.msk.msra.mxu0 %vm253_vm0, %v247_v0  ;;  %499 = vmatpush.msk.msra.mxu1 %vm253_vm0, %v247_v0  ;;  %v498_v5 = vld [vmem:[%s641_s1 + $0x8] sm:$0x3f]  ;;  %s494_s28 = sshll.u32 %s649_s12, 2  ;;  %s495_s5 = sshll.u32 %s649_s12, 3 }
   0xf   : > { %330 = vmatpush.msra.mxu2 %v246_v1  ;;  %359 = vmatpush.msra.mxu3 %v246_v1  ;;  %s227_s4 = scalar_lea.vmem %s640_s0, %s494_s28  ;;  %s245_s8 = scalar_lea.vmem %s643_s3, %s495_s5 }
  0x10   : > { %503 = vmatmul.msk.f32.vlgmr.msra.gmra.mxu2 %vm249_vm1, %v501_v2  ;;  %506 = vmatmul.msk.f32.vlgmr.msra.gmra.mxu3 %vm249_vm1, %v504_v3  ;;  %v533_v6 = vld [vmem:[%s227_s4] ss:$0 sm:$0xff]  ;;  %v534_v7 = vld [vmem:[%s227_s4 + $0x1] ss:$0 sm:$0xff]  ;;  %v535_v12 = vld [vmem:[%s227_s4 + $0x2] ss:$0 sm:$0xff] }
  0x11   : > { %272 = vmatpush.msra.mxu0 %v246_v1  ;;  %301 = vmatpush.msra.mxu1 %v246_v1  ;;  %v536_v13 = vld [vmem:[%s227_s4 + $0x3] ss:$0 sm:$0xff] }
  0x12   : > { %497 = vmatmul.msk.f32.vlgmr.msra.gmra.mxu0 %vm249_vm1, %v248_v4  ;;  %500 = vmatmul.msk.f32.vlgmr.msra.gmra.mxu1 %vm249_vm1, %v498_v5 }
  0x8f   : > { %v274_v8 = vpop.f32.mrf.mxu0  ;;  %v303_v9 = vpop.f32.mrf.mxu1 }
  0x90   : > { %v279_v10 = vmul.f32 %v533_v6, %v274_v8  ;;  %v308_v11 = vmul.f32 %v534_v7, %v303_v9 }
  0x92   : > { %v309_v14 = vadd.f32 %v308_v11, %v279_v10 }
  0x93   : > { %v332_v15 = vpop.f32.mrf.mxu2  ;;  %v361_v16 = vpop.f32.mrf.mxu3 }
  0x94   : > { %v337_v17 = vmul.f32 %v535_v12, %v332_v15  ;;  %v366_v18 = vmul.f32 %v536_v13, %v361_v16 }
  0x96   : > { %v338_v19 = vadd.f32 %v337_v17, %v309_v14 }
  0x98   : > { %v367_v20 = vadd.f32 %v366_v18, %v338_v19 }
  0x9a   : > { %368 = vst [vmem:[%s245_s8] sm:$0x3f] %v367_v20 }
  0x9b PF: > { %s13_s14 = sadd.s32 1, %s559_s14   ;;  %s644_s12 = smov %s555_s13 }
  0x9c   : > { %p10_p5 = scmp.ge.s32.totalorder %s13_s14, 4   ;;  %s645_s13 = smov %s647_s15 }
  0x9e   :  { %12 = sbr.rel (!%p10_p5) target bundleno = 2 (0x2), region = 71 }

</bundles_post_ra>
